<compile_context>
chip_gen: v7x
topology: tpu7x:2x2x1
jax: 0.10.0
libtpu: 0.0.40
codegen_flags: <defaults>
</compile_context>

<pallas_src>
import jax
import jax.numpy as jnp
from jax import lax
from jax.experimental import pallas as pl
from jax.experimental.pallas import tpu as pltpu


def _smoothness_kernel(depth_ref, mask_ref, view_ref, out_ref,
                       prev_depth_ref, prev_mask_ref, prev_rv_ref):
    """One (batch-tile, row-tile) grid step.

    Block views (singleton / view dims squeezed by the BlockSpecs):
      depth_ref : (TB, TH, W)     = depth_maps[:, 0]
      mask_ref  : (TB, TH, W)     = masks[:, 0, 0]
      view_ref  : (TB, C, TH, W)  = views[:, 0]
    Emits a lane-dense (1, 1, 8, 128) tile of partials:
      lane 0 = masked |d_x| + |d_y| sum of this tile, lane 1 = mask count.
    """
    h = pl.program_id(1)
    num_h = pl.num_programs(1)

    # Cast-on-load: inputs may arrive in narrow HBM dtypes (bf16 views/depth,
    # bool/uint8 masks).  Compute stays f32 (v5e VPU/EUP have no bf16).
    depth = depth_ref[...].astype(jnp.float32)          # (TB, TH, W)
    mask = mask_ref[...].astype(jnp.float32)            # (TB, TH, W)

    TB, TH, W = depth.shape
    C = view_ref.shape[1]
    inv_c = 1.0 / float(C)

    # Reset the row carry at the first row tile of every batch tile (also
    # covers the very first grid step, whose scratch is uninitialized).
    @pl.when(h == 0)
    def _():
        prev_depth_ref[...] = jnp.zeros_like(prev_depth_ref)
        prev_mask_ref[...] = jnp.zeros_like(prev_mask_ref)
        prev_rv_ref[...] = jnp.zeros_like(prev_rv_ref)

    # --- edge-aware weights: exp(-mean_C |grad(views[:,0] * mask)|) ---------
    # Forward differences via XLU rolls; the wrapped last column / last row is
    # garbage and never reaches the sums (fixed / gated below).
    sum_abs_dx = jnp.zeros((TB, TH, W), jnp.float32)
    sum_abs_dy = jnp.zeros((TB, TH, W), jnp.float32)
    sum_abs_bnd = jnp.zeros((TB, W), jnp.float32)       # row-tile boundary
    for c in range(C):                                  # small static unroll
        rv = view_ref[:, c, :, :].astype(jnp.float32) * mask   # (TB, TH, W)
        sum_abs_dx += jnp.abs(pltpu.roll(rv, W - 1, axis=2) - rv)
        sum_abs_dy += jnp.abs(pltpu.roll(rv, TH - 1, axis=1) - rv)
        # previous tile's last masked-view row vs this tile's first row
        sum_abs_bnd += jnp.abs(rv[:, 0, :] - prev_rv_ref[c])
        # carry this tile's last masked-view row for the next row tile
        prev_rv_ref[c] = rv[:, TH - 1, :]

    # channel mean folded into the exp argument (constant 1/C multiply)
    w_x = jnp.exp(-sum_abs_dx * inv_c)                  # (TB, TH, W)
    w_y = jnp.exp(-sum_abs_dy * inv_c)
    # TODO(synk): if profiling shows the single EUP slot binding, evaluate
    # w_x / w_y in bf16 on v6e/v7x (not v5e).

    # --- weighted depth gradients -------------------------------------------
    abs_dx = jnp.abs((pltpu.roll(depth, W - 1, axis=2) - depth) * w_x)
    abs_dy = jnp.abs((pltpu.roll(depth, TH - 1, axis=1) - depth) * w_y)

    # Replicate-pad handling (F.pad(..., mode='replicate')) with small
    # (1, TH, W) masks instead of full (TB, TH, W) iotas:
    #   * last image column duplicates column W-2 (every row, every tile),
    #   * last image row duplicates row H-2 -> only in the last row tile;
    #     interior tile boundaries are handled by the carried-row term of the
    #     *next* tile, so the last in-tile row is gated to zero here.
    lane = lax.broadcasted_iota(jnp.int32, (1, TH, W), 2)
    row = lax.broadcasted_iota(jnp.int32, (1, TH, W), 1)
    is_last_h = (h == num_h - 1).astype(jnp.float32)    # scalar 0/1
    abs_dx = jnp.where(lane == W - 1, pltpu.roll(abs_dx, 1, axis=2), abs_dx)
    abs_dy = jnp.where(row == TH - 1,
                       is_last_h * pltpu.roll(abs_dy, 1, axis=1), abs_dy)

    ind = (mask > 0.5).astype(jnp.float32)

    # Cross-row-tile |d_y| term (previous tile's last row vs this tile's first
    # row), masked by the previous row's indicator (zero at h == 0).
    w_y_bnd = jnp.exp(-sum_abs_bnd * inv_c)             # (TB, W)
    prev_depth = prev_depth_ref[...]                    # (TB, W)
    ind_prev = (prev_mask_ref[...] > 0.5).astype(jnp.float32)
    bnd = jnp.abs((depth[:, 0, :] - prev_depth) * w_y_bnd) * ind_prev

    # NOTE: d_x2 / d_xy / d_yx / d_y2 in the PyTorch module are dead code
    # (unused by the returned loss), so they are intentionally not computed.

    # merged |d_x| + |d_y| masked sum (single reduction) + boundary + count
    grad_sum = jnp.sum((abs_dx + abs_dy) * ind) + jnp.sum(bnd)
    cnt = jnp.sum(ind)

    # carry this tile's last depth / mask row for the next row tile
    prev_depth_ref[...] = depth[:, TH - 1, :]
    prev_mask_ref[...] = mask[:, TH - 1, :]

    # lane-dense partials: lane 0 = masked grad sum, lane 1 = mask count
    lane_out = lax.broadcasted_iota(jnp.int32, (1, 1, 8, 128), 3)
    out_ref[...] = (jnp.where(lane_out == 0, grad_sum, 0.0)
                    + jnp.where(lane_out == 1, cnt, 0.0))


def _vmem_capacity_bytes():
    """Physical VMEM of the attached TPU; conservative fallback if unknown."""
    try:
        return int(pltpu.get_tpu_info().vmem_capacity_bytes)
    except Exception:
        return 64 << 20                     # v7x physical VMEM (smallest gen)


def _pick_tiles(B, H, W, C, in_bytes_per_pixel, budget_bytes,
                max_rows_per_tile=None):
    """Pick (TB, TH) so one grid step's *real* VMEM footprint fits the budget.

    The footprint counts the double-buffered input blocks, ~12 live f32
    (TB, TH, W) temporaries inside the kernel body, the carried-row scratch
    and the double-buffered output tile.
    """
    TEMPS_F32 = 12

    def footprint(tb, th):
        px = tb * th * W
        inputs = 2 * px * in_bytes_per_pixel            # double-buffered
        temps = TEMPS_F32 * px * 4
        carry = (2 + C) * tb * W * 4
        out = 2 * 8 * 128 * 4
        return inputs + temps + carry + out

    # Row-tile candidates: H itself, or divisors of H that are multiples of 8
    # (keeps the (8, 128) BlockSpec rule); at least 2 rows so the replicate
    # pad of the last image row stays inside one tile.
    th_cands = sorted({d for d in range(8, H + 1, 8) if H % d == 0} | {H},
                      reverse=True)
    th_cands = [t for t in th_cands if t >= min(2, H)]
    if max_rows_per_tile is not None:
        th_cands = ([t for t in th_cands if t <= max_rows_per_tile]
                    or [min(th_cands)])

    # Batch-tile candidates: divisors of B, capped so the (parallel) batch
    # grid axis has >= 2 steps (uses both v7x TensorCores).
    tb_cap = max(1, B // 2)
    tb_cands = sorted([d for d in range(1, tb_cap + 1) if B % d == 0],
                      reverse=True)

    for th in th_cands:                     # prefer tall row tiles,
        for tb in tb_cands:                 # then fat batch tiles
            if footprint(tb, th) <= budget_bytes:
                return tb, th, footprint(tb, th)
    tb, th = tb_cands[-1], th_cands[-1]     # smallest tiles; raise VMEM limit
    return tb, th, footprint(tb, th)


def smoothness_loss(depth_maps, data_sample, *, max_rows_per_tile=None):
    """Pallas-TPU forward of DRACO's Smoothness_loss.

    depth_maps              : (B, 1, H, W)
    data_sample['masks']    : (B, V, 1, H, W)   (view 0 is used)
    data_sample['views']    : (B, V, C, H, W)   (view 0 is used)

    The original arrays are passed straight to pallas_call (no wrapper-side
    slicing / casting copies); view 0 / singleton dims are selected in the
    BlockSpecs and narrow dtypes are cast to f32 inside the kernel.
    """
    masks = data_sample["masks"]
    views = data_sample["views"]
    B = depth_maps.shape[0]
    H, W = depth_maps.shape[-2], depth_maps.shape[-1]
    C = views.shape[2]

    in_bpp = (jnp.dtype(depth_maps.dtype).itemsize
              + jnp.dtype(masks.dtype).itemsize
              + C * jnp.dtype(views.dtype).itemsize)

    cap = _vmem_capacity_bytes()
    # Tile-picking budget: half of physical VMEM, never more than ~48 MiB
    # (v7x has 64 MiB physical / 32 MiB scoped default).
    budget = min(cap // 2, 48 << 20)
    TB, TH, fp = _pick_tiles(B, H, W, C, in_bpp, budget, max_rows_per_tile)
    GB, GH = B // TB, H // TH
    # Raise the scoped-VMEM limit only as far as needed (with headroom),
    # capped at 3/4 of physical so it is safe on every generation.
    vmem_limit = int(min(cap * 3 // 4, max(32 << 20, fp + (8 << 20))))

    # TODO(synk): W is the lane axis -- for production images keep W a
    # multiple of 128 (or fold W tiles into lanes) for full vreg occupancy;
    # H values with no multiple-of-8 divisor currently fall back to TH = H.

    partials = pl.pallas_call(
        _smoothness_kernel,
        out_shape=jax.ShapeDtypeStruct((GB, GH, 8, 128), jnp.float32),
        grid_spec=pltpu.PrefetchScalarGridSpec(
            num_scalar_prefetch=0,
            grid=(GB, GH),
            in_specs=[
                # depth_maps (B, 1, H, W) -> kernel (TB, TH, W)
                pl.BlockSpec((TB, pl.Squeezed(), TH, W),
                             lambda b, h: (b, 0, h, 0)),
                # masks (B, V, 1, H, W) -> view 0 -> kernel (TB, TH, W)
                pl.BlockSpec((TB, pl.Squeezed(), pl.Squeezed(), TH, W),
                             lambda b, h: (b, 0, 0, h, 0)),
                # views (B, V, C, H, W) -> view 0 -> kernel (TB, C, TH, W)
                pl.BlockSpec((TB, pl.Squeezed(), C, TH, W),
                             lambda b, h: (b, 0, 0, h, 0)),
            ],
            out_specs=pl.BlockSpec((1, 1, 8, 128), lambda b, h: (b, h, 0, 0)),
            scratch_shapes=[
                pltpu.VMEM((TB, W), jnp.float32),       # prev depth row
                pltpu.VMEM((TB, W), jnp.float32),       # prev mask row
                pltpu.VMEM((C, TB, W), jnp.float32),    # prev masked-view row
            ],
        ),
        compiler_params=pltpu.CompilerParams(
            dimension_semantics=("parallel", "arbitrary"),
            vmem_limit_bytes=vmem_limit,
        ),
    )(depth_maps, masks, views)

    grad_total = jnp.sum(partials[:, :, 0, 0])
    cnt = jnp.sum(partials[:, :, 0, 1])
    # NOTE: the PyTorch reference returns NaN for an all-empty mask; the
    # max(cnt, 1) guard is an intentional, documented deviation.
    return grad_total / jnp.maximum(cnt, 1.0)


def smoothness_loss_ref(depth_maps, data_sample):
    """Pure-JAX reference mirroring the PyTorch forward (f32 compute)."""
    mask = data_sample["masks"][:, 0].astype(jnp.float32)        # (B,1,H,W)
    view0 = data_sample["views"][:, 0].astype(jnp.float32)       # (B,C,H,W)
    depth = depth_maps.astype(jnp.float32)                       # (B,1,H,W)
    ref_view = view0 * mask
    dxi = ref_view[:, :, :, 1:] - ref_view[:, :, :, :-1]
    dyi = ref_view[:, :, 1:, :] - ref_view[:, :, :-1, :]
    wx = jnp.exp(-jnp.mean(jnp.abs(dxi), axis=1, keepdims=True))
    wy = jnp.exp(-jnp.mean(jnp.abs(dyi), axis=1, keepdims=True))
    dx = (depth[:, :, :, 1:] - depth[:, :, :, :-1]) * wx
    dy = (depth[:, :, 1:, :] - depth[:, :, :-1, :]) * wy
    dx = jnp.concatenate([dx, dx[:, :, :, -1:]], axis=3)
    dy = jnp.concatenate([dy, dy[:, :, -1:, :]], axis=2)
    sel = (mask > 0.5).astype(jnp.float32)
    cnt = jnp.sum(sel)
    return jnp.sum(jnp.abs(dx) * sel) / cnt + jnp.sum(jnp.abs(dy) * sel) / cnt


if __name__ == "__main__":
    def run_case(key, B, V, C, H, W, max_rows_per_tile=None):
        k1, k2, k3 = jax.random.split(key, 3)
        depth_maps = jax.random.uniform(k1, (B, 1, H, W), jnp.float32, 0.1, 5.0)
        # narrow-dtype HBM inputs: bf16 views, f32 depth / mask
        views = jax.random.uniform(
            k2, (B, V, C, H, W), jnp.float32).astype(jnp.bfloat16)
        masks = (jax.random.uniform(k3, (B, V, 1, H, W)) > 0.3
                 ).astype(jnp.float32)
        data_sample = {"masks": masks, "views": views}

        loss = smoothness_loss(depth_maps, data_sample,
                               max_rows_per_tile=max_rows_per_tile)
        jax.block_until_ready(loss)
        ref = smoothness_loss_ref(depth_maps, data_sample)
        assert jnp.allclose(loss, ref, rtol=5e-5, atol=1e-5), (loss, ref)

    key = jax.random.PRNGKey(0)
    k_a, k_b = jax.random.split(key)
    # single row tile (TH == H), batch grid of 2
    run_case(k_a, B=2, V=2, C=3, H=16, W=16)
    # H != W and forced row tiling (4 row tiles) to exercise the carried-row
    # boundary path and the replicate pad of the last image row
    run_case(k_b, B=2, V=2, C=3, H=32, W=16, max_rows_per_tile=8)
    print("KERNEL_OK")
</pallas_src>

<mosaic_0001>
module attributes {stable_mosaic.version = 11 : i64} {
  func.func @_smoothness_kernel(%arg0: i32, %arg1: i32, %arg2: memref<1x1x16x16xf32, #tpu.memory_space<vmem>>, %arg3: memref<1x1x1x16x16xf32, #tpu.memory_space<vmem>>, %arg4: memref<1x1x3x16x16xbf16, #tpu.memory_space<vmem>>, %arg5: memref<1x1x8x128xf32, #tpu.memory_space<vmem>>, %arg6: memref<1x16xf32, #tpu.memory_space<vmem>>, %arg7: memref<1x16xf32, #tpu.memory_space<vmem>>, %arg8: memref<3x1x16xf32, #tpu.memory_space<vmem>>) attributes {dimension_semantics = [#tpu.dimension_semantics<parallel>, #tpu.dimension_semantics<arbitrary>], iteration_bounds = array<i64: 2, 1>, scalar_prefetch = 0 : i64, scratch_operands = 3 : i64, tpu.core_type = #tpu.core_type<tc>, window_params = [{transform_indices = @transform_0, window_bounds = array<i64: 1, 1, 16, 16>}, {transform_indices = @transform_1, window_bounds = array<i64: 1, 1, 1, 16, 16>}, {transform_indices = @transform_2, window_bounds = array<i64: 1, 1, 3, 16, 16>}, {transform_indices = @transform_3, window_bounds = array<i64: 1, 1, 8, 128>}]} {
    %c0 = arith.constant 0 : index
    %c0_0 = arith.constant 0 : index
    %c0_1 = arith.constant 0 : index
    %c0_2 = arith.constant 0 : index
    %0 = vector.load %arg2[%c0, %c0_0, %c0_1, %c0_2] : memref<1x1x16x16xf32, #tpu.memory_space<vmem>>, vector<1x1x16x16xf32>
    %1 = vector.shape_cast %0 : vector<1x1x16x16xf32> to vector<1x16x16xf32>
    %c0_3 = arith.constant 0 : index
    %c0_4 = arith.constant 0 : index
    %c0_5 = arith.constant 0 : index
    %c0_6 = arith.constant 0 : index
    %c0_7 = arith.constant 0 : index
    %2 = vector.load %arg3[%c0_3, %c0_4, %c0_5, %c0_6, %c0_7] : memref<1x1x1x16x16xf32, #tpu.memory_space<vmem>>, vector<1x1x1x16x16xf32>
    %3 = vector.shape_cast %2 : vector<1x1x1x16x16xf32> to vector<1x16x16xf32>
    %c0_i32 = arith.constant 0 : i32
    %4 = arith.cmpi eq, %arg1, %c0_i32 : i32
    %5 = arith.extui %4 : i1 to i32
    %c0_i32_8 = arith.constant 0 : i32
    %6 = arith.cmpi ne, %5, %c0_i32_8 : i32
    scf.if %6 {
      %cst_80 = arith.constant 0.000000e+00 : f32
      %170 = vector.broadcast %cst_80 : f32 to vector<1x16xf32>
      %c0_81 = arith.constant 0 : index
      %c0_82 = arith.constant 0 : index
      %171 = vector.load %arg6[%c0_81, %c0_82] : memref<1x16xf32, #tpu.memory_space<vmem>>, vector<1x16xf32>
      tpu.vector_store %arg6[%c0_81, %c0_82], %170 {strides = array<i32>} : memref<1x16xf32, #tpu.memory_space<vmem>>, vector<1x16xf32>,
      %cst_83 = arith.constant 0.000000e+00 : f32
      %172 = vector.broadcast %cst_83 : f32 to vector<1x16xf32>
      %c0_84 = arith.constant 0 : index
      %c0_85 = arith.constant 0 : index
      %173 = vector.load %arg7[%c0_84, %c0_85] : memref<1x16xf32, #tpu.memory_space<vmem>>, vector<1x16xf32>
      tpu.vector_store %arg7[%c0_84, %c0_85], %172 {strides = array<i32>} : memref<1x16xf32, #tpu.memory_space<vmem>>, vector<1x16xf32>,
      %cst_86 = arith.constant 0.000000e+00 : f32
      %174 = vector.broadcast %cst_86 : f32 to vector<3x1x16xf32>
      %c0_87 = arith.constant 0 : index
      %c0_88 = arith.constant 0 : index
      %c0_89 = arith.constant 0 : index
      %175 = vector.load %arg8[%c0_87, %c0_88, %c0_89] : memref<3x1x16xf32, #tpu.memory_space<vmem>>, vector<3x1x16xf32>
      tpu.vector_store %arg8[%c0_87, %c0_88, %c0_89], %174 {strides = array<i32>} : memref<3x1x16xf32, #tpu.memory_space<vmem>>, vector<3x1x16xf32>,
    } else {
    }
    %cst = arith.constant 0.000000e+00 : f32
    %7 = vector.broadcast %cst : f32 to vector<1x16x16xf32>
    %cst_9 = arith.constant 0.000000e+00 : f32
    %8 = vector.broadcast %cst_9 : f32 to vector<1x16x16xf32>
    %cst_10 = arith.constant 0.000000e+00 : f32
    %9 = vector.broadcast %cst_10 : f32 to vector<1x16xf32>
    %c0_11 = arith.constant 0 : index
    %c0_12 = arith.constant 0 : index
    %c0_13 = arith.constant 0 : index
    %c0_14 = arith.constant 0 : index
    %c0_15 = arith.constant 0 : index
    %10 = vector.load %arg4[%c0_11, %c0_12, %c0_13, %c0_14, %c0_15] : memref<1x1x3x16x16xbf16, #tpu.memory_space<vmem>>, vector<1x1x1x16x16xbf16>
    %11 = vector.shape_cast %10 : vector<1x1x1x16x16xbf16> to vector<1x16x16xbf16>
    %12 = arith.extf %11 : vector<1x16x16xbf16> to vector<1x16x16xf32>
    %13 = arith.mulf %12, %3 : vector<1x16x16xf32>
    %c15_i32 = arith.constant 15 : i32
    %14 = tpu.dynamic_rotate %13 by %c15_i32 dim 2 : vector<1x16x16xf32>, i32 -> vector<1x16x16xf32>
    %15 = arith.subf %14, %13 : vector<1x16x16xf32>
    %16 = math.absf %15 : vector<1x16x16xf32>
    %17 = arith.addf %7, %16 : vector<1x16x16xf32>
    %c15_i32_16 = arith.constant 15 : i32
    %18 = tpu.dynamic_rotate %13 by %c15_i32_16 dim 1 : vector<1x16x16xf32>, i32 -> vector<1x16x16xf32>
    %19 = arith.subf %18, %13 : vector<1x16x16xf32>
    %20 = math.absf %19 : vector<1x16x16xf32>
    %21 = arith.addf %8, %20 : vector<1x16x16xf32>
    %22 = vector.extract_strided_slice %13 {offsets = [0, 0, 0], sizes = [1, 1, 16], strides = [1, 1, 1]} : vector<1x16x16xf32> to vector<1x1x16xf32>
    %23 = vector.shape_cast %22 : vector<1x1x16xf32> to vector<1x16xf32>
    %c0_17 = arith.constant 0 : index
    %c0_18 = arith.constant 0 : index
    %c0_19 = arith.constant 0 : index
    %24 = vector.load %arg8[%c0_17, %c0_18, %c0_19] : memref<3x1x16xf32, #tpu.memory_space<vmem>>, vector<1x1x16xf32>
    %25 = vector.shape_cast %24 : vector<1x1x16xf32> to vector<1x16xf32>
    %26 = arith.subf %23, %25 : vector<1x16xf32>
    %27 = math.absf %26 : vector<1x16xf32>
    %28 = arith.addf %9, %27 : vector<1x16xf32>
    %29 = vector.extract_strided_slice %13 {offsets = [0, 15, 0], sizes = [1, 1, 16], strides = [1, 1, 1]} : vector<1x16x16xf32> to vector<1x1x16xf32>
    %30 = vector.shape_cast %29 : vector<1x1x16xf32> to vector<1x16xf32>
    %c0_20 = arith.constant 0 : index
    %c0_21 = arith.constant 0 : index
    %c0_22 = arith.constant 0 : index
    %31 = vector.load %arg8[%c0_20, %c0_21, %c0_22] : memref<3x1x16xf32, #tpu.memory_space<vmem>>, vector<1x1x16xf32>
    %32 = vector.shape_cast %31 : vector<1x1x16xf32> to vector<1x16xf32>
    %33 = vector.shape_cast %30 : vector<1x16xf32> to vector<1x1x16xf32>
    tpu.vector_store %arg8[%c0_20, %c0_21, %c0_22], %33 {strides = array<i32>} : memref<3x1x16xf32, #tpu.memory_space<vmem>>, vector<1x1x16xf32>,
    %c0_23 = arith.constant 0 : index
    %c0_24 = arith.constant 0 : index
    %c1 = arith.constant 1 : index
    %c0_25 = arith.constant 0 : index
    %c0_26 = arith.constant 0 : index
    %34 = vector.load %arg4[%c0_23, %c0_24, %c1, %c0_25, %c0_26] : memref<1x1x3x16x16xbf16, #tpu.memory_space<vmem>>, vector<1x1x1x16x16xbf16>
    %35 = vector.shape_cast %34 : vector<1x1x1x16x16xbf16> to vector<1x16x16xbf16>
    %36 = arith.extf %35 : vector<1x16x16xbf16> to vector<1x16x16xf32>
    %37 = arith.mulf %36, %3 : vector<1x16x16xf32>
    %c15_i32_27 = arith.constant 15 : i32
    %38 = tpu.dynamic_rotate %37 by %c15_i32_27 dim 2 : vector<1x16x16xf32>, i32 -> vector<1x16x16xf32>
    %39 = arith.subf %38, %37 : vector<1x16x16xf32>
    %40 = math.absf %39 : vector<1x16x16xf32>
    %41 = arith.addf %17, %40 : vector<1x16x16xf32>
    %c15_i32_28 = arith.constant 15 : i32
    %42 = tpu.dynamic_rotate %37 by %c15_i32_28 dim 1 : vector<1x16x16xf32>, i32 -> vector<1x16x16xf32>
    %43 = arith.subf %42, %37 : vector<1x16x16xf32>
    %44 = math.absf %43 : vector<1x16x16xf32>
    %45 = arith.addf %21, %44 : vector<1x16x16xf32>
    %46 = vector.extract_strided_slice %37 {offsets = [0, 0, 0], sizes = [1, 1, 16], strides = [1, 1, 1]} : vector<1x16x16xf32> to vector<1x1x16xf32>
    %47 = vector.shape_cast %46 : vector<1x1x16xf32> to vector<1x16xf32>
    %c1_29 = arith.constant 1 : index
    %c0_30 = arith.constant 0 : index
    %c0_31 = arith.constant 0 : index
    %48 = vector.load %arg8[%c1_29, %c0_30, %c0_31] : memref<3x1x16xf32, #tpu.memory_space<vmem>>, vector<1x1x16xf32>
    %49 = vector.shape_cast %48 : vector<1x1x16xf32> to vector<1x16xf32>
    %50 = arith.subf %47, %49 : vector<1x16xf32>
    %51 = math.absf %50 : vector<1x16xf32>
    %52 = arith.addf %28, %51 : vector<1x16xf32>
    %53 = vector.extract_strided_slice %37 {offsets = [0, 15, 0], sizes = [1, 1, 16], strides = [1, 1, 1]} : vector<1x16x16xf32> to vector<1x1x16xf32>
    %54 = vector.shape_cast %53 : vector<1x1x16xf32> to vector<1x16xf32>
    %c1_32 = arith.constant 1 : index
    %c0_33 = arith.constant 0 : index
    %c0_34 = arith.constant 0 : index
    %55 = vector.load %arg8[%c1_32, %c0_33, %c0_34] : memref<3x1x16xf32, #tpu.memory_space<vmem>>, vector<1x1x16xf32>
    %56 = vector.shape_cast %55 : vector<1x1x16xf32> to vector<1x16xf32>
    %57 = vector.shape_cast %54 : vector<1x16xf32> to vector<1x1x16xf32>
    tpu.vector_store %arg8[%c1_32, %c0_33, %c0_34], %57 {strides = array<i32>} : memref<3x1x16xf32, #tpu.memory_space<vmem>>, vector<1x1x16xf32>,
    %c0_35 = arith.constant 0 : index
    %c0_36 = arith.constant 0 : index
    %c2 = arith.constant 2 : index
    %c0_37 = arith.constant 0 : index
    %c0_38 = arith.constant 0 : index
    %58 = vector.load %arg4[%c0_35, %c0_36, %c2, %c0_37, %c0_38] : memref<1x1x3x16x16xbf16, #tpu.memory_space<vmem>>, vector<1x1x1x16x16xbf16>
    %59 = vector.shape_cast %58 : vector<1x1x1x16x16xbf16> to vector<1x16x16xbf16>
    %60 = arith.extf %59 : vector<1x16x16xbf16> to vector<1x16x16xf32>
    %61 = arith.mulf %60, %3 : vector<1x16x16xf32>
    %c15_i32_39 = arith.constant 15 : i32
    %62 = tpu.dynamic_rotate %61 by %c15_i32_39 dim 2 : vector<1x16x16xf32>, i32 -> vector<1x16x16xf32>
    %63 = arith.subf %62, %61 : vector<1x16x16xf32>
    %64 = math.absf %63 : vector<1x16x16xf32>
    %65 = arith.addf %41, %64 : vector<1x16x16xf32>
    %c15_i32_40 = arith.constant 15 : i32
    %66 = tpu.dynamic_rotate %61 by %c15_i32_40 dim 1 : vector<1x16x16xf32>, i32 -> vector<1x16x16xf32>
    %67 = arith.subf %66, %61 : vector<1x16x16xf32>
    %68 = math.absf %67 : vector<1x16x16xf32>
    %69 = arith.addf %45, %68 : vector<1x16x16xf32>
    %70 = vector.extract_strided_slice %61 {offsets = [0, 0, 0], sizes = [1, 1, 16], strides = [1, 1, 1]} : vector<1x16x16xf32> to vector<1x1x16xf32>
    %71 = vector.shape_cast %70 : vector<1x1x16xf32> to vector<1x16xf32>
    %c2_41 = arith.constant 2 : index
    %c0_42 = arith.constant 0 : index
    %c0_43 = arith.constant 0 : index
    %72 = vector.load %arg8[%c2_41, %c0_42, %c0_43] : memref<3x1x16xf32, #tpu.memory_space<vmem>>, vector<1x1x16xf32>
    %73 = vector.shape_cast %72 : vector<1x1x16xf32> to vector<1x16xf32>
    %74 = arith.subf %71, %73 : vector<1x16xf32>
    %75 = math.absf %74 : vector<1x16xf32>
    %76 = arith.addf %52, %75 : vector<1x16xf32>
    %77 = vector.extract_strided_slice %61 {offsets = [0, 15, 0], sizes = [1, 1, 16], strides = [1, 1, 1]} : vector<1x16x16xf32> to vector<1x1x16xf32>
    %78 = vector.shape_cast %77 : vector<1x1x16xf32> to vector<1x16xf32>
    %c2_44 = arith.constant 2 : index
    %c0_45 = arith.constant 0 : index
    %c0_46 = arith.constant 0 : index
    %79 = vector.load %arg8[%c2_44, %c0_45, %c0_46] : memref<3x1x16xf32, #tpu.memory_space<vmem>>, vector<1x1x16xf32>
    %80 = vector.shape_cast %79 : vector<1x1x16xf32> to vector<1x16xf32>
    %81 = vector.shape_cast %78 : vector<1x16xf32> to vector<1x1x16xf32>
    tpu.vector_store %arg8[%c2_44, %c0_45, %c0_46], %81 {strides = array<i32>} : memref<3x1x16xf32, #tpu.memory_space<vmem>>, vector<1x1x16xf32>,
    %cst_47 = arith.constant 0.000000e+00 : f32
    %82 = vector.broadcast %cst_47 : f32 to vector<1x16x16xf32>
    %83 = arith.subf %82, %65 : vector<1x16x16xf32>
    %cst_48 = arith.constant 0.333333343 : f32
    %84 = vector.broadcast %cst_48 : f32 to vector<1x16x16xf32>
    %85 = arith.mulf %83, %84 : vector<1x16x16xf32>
    %86 = math.exp %85 : vector<1x16x16xf32>
    %cst_49 = arith.constant 0.000000e+00 : f32
    %87 = vector.broadcast %cst_49 : f32 to vector<1x16x16xf32>
    %88 = arith.subf %87, %69 : vector<1x16x16xf32>
    %cst_50 = arith.constant 0.333333343 : f32
    %89 = vector.broadcast %cst_50 : f32 to vector<1x16x16xf32>
    %90 = arith.mulf %88, %89 : vector<1x16x16xf32>
    %91 = math.exp %90 : vector<1x16x16xf32>
    %c15_i32_51 = arith.constant 15 : i32
    %92 = tpu.dynamic_rotate %1 by %c15_i32_51 dim 2 : vector<1x16x16xf32>, i32 -> vector<1x16x16xf32>
    %93 = arith.subf %92, %1 : vector<1x16x16xf32>
    %94 = arith.mulf %93, %86 : vector<1x16x16xf32>
    %95 = math.absf %94 : vector<1x16x16xf32>
    %c15_i32_52 = arith.constant 15 : i32
    %96 = tpu.dynamic_rotate %1 by %c15_i32_52 dim 1 : vector<1x16x16xf32>, i32 -> vector<1x16x16xf32>
    %97 = arith.subf %96, %1 : vector<1x16x16xf32>
    %98 = arith.mulf %97, %91 : vector<1x16x16xf32>
    %99 = math.absf %98 : vector<1x16x16xf32>
    %100 = tpu.iota {dimensions = array<i32: 2>} : vector<1x16x16xi32>
    %101 = tpu.iota {dimensions = array<i32: 1>} : vector<1x16x16xi32>
    %c0_i32_53 = arith.constant 0 : i32
    %102 = arith.cmpi eq, %arg1, %c0_i32_53 : i32
    %103 = arith.extui %102 : i1 to i32
    %104 = arith.sitofp %103 : i32 to f32
    %c15_i32_54 = arith.constant 15 : i32
    %105 = vector.broadcast %c15_i32_54 : i32 to vector<1x16x16xi32>
    %106 = arith.cmpi eq, %100, %105 : vector<1x16x16xi32>
    %c1_i32 = arith.constant 1 : i32
    %107 = tpu.dynamic_rotate %95 by %c1_i32 dim 2 : vector<1x16x16xf32>, i32 -> vector<1x16x16xf32>
    %108 = arith.select %106, %107, %95 : vector<1x16x16xi1>, vector<1x16x16xf32>
    %c15_i32_55 = arith.constant 15 : i32
    %109 = vector.broadcast %c15_i32_55 : i32 to vector<1x16x16xi32>
    %110 = arith.cmpi eq, %101, %109 : vector<1x16x16xi32>
    %c1_i32_56 = arith.constant 1 : i32
    %111 = tpu.dynamic_rotate %99 by %c1_i32_56 dim 1 : vector<1x16x16xf32>, i32 -> vector<1x16x16xf32>
    %112 = vector.broadcast %104 : f32 to vector<1x16x16xf32>
    %113 = arith.mulf %112, %111 : vector<1x16x16xf32>
    %114 = arith.select %110, %113, %99 : vector<1x16x16xi1>, vector<1x16x16xf32>
    %cst_57 = arith.constant 5.000000e-01 : f32
    %115 = vector.broadcast %cst_57 : f32 to vector<1x16x16xf32>
    %116 = arith.cmpf ogt, %3, %115 : vector<1x16x16xf32>
    %117 = arith.extui %116 : vector<1x16x16xi1> to vector<1x16x16xi32>
    %118 = arith.sitofp %117 : vector<1x16x16xi32> to vector<1x16x16xf32>
    %cst_58 = arith.constant 0.000000e+00 : f32
    %119 = vector.broadcast %cst_58 : f32 to vector<1x16xf32>
    %120 = arith.subf %119, %76 : vector<1x16xf32>
    %cst_59 = arith.constant 0.333333343 : f32
    %121 = vector.broadcast %cst_59 : f32 to vector<1x16xf32>
    %122 = arith.mulf %120, %121 : vector<1x16xf32>
    %123 = math.exp %122 : vector<1x16xf32>
    %c0_60 = arith.constant 0 : index
    %c0_61 = arith.constant 0 : index
    %124 = vector.load %arg6[%c0_60, %c0_61] : memref<1x16xf32, #tpu.memory_space<vmem>>, vector<1x16xf32>
    %c0_62 = arith.constant 0 : index
    %c0_63 = arith.constant 0 : index
    %125 = vector.load %arg7[%c0_62, %c0_63] : memref<1x16xf32, #tpu.memory_space<vmem>>, vector<1x16xf32>
    %cst_64 = arith.constant 5.000000e-01 : f32
    %126 = vector.broadcast %cst_64 : f32 to vector<1x16xf32>
    %127 = arith.cmpf ogt, %125, %126 : vector<1x16xf32>
    %128 = arith.extui %127 : vector<1x16xi1> to vector<1x16xi32>
    %129 = arith.sitofp %128 : vector<1x16xi32> to vector<1x16xf32>
    %130 = vector.extract_strided_slice %1 {offsets = [0, 0, 0], sizes = [1, 1, 16], strides = [1, 1, 1]} : vector<1x16x16xf32> to vector<1x1x16xf32>
    %131 = vector.shape_cast %130 : vector<1x1x16xf32> to vector<1x16xf32>
    %132 = arith.subf %131, %124 : vector<1x16xf32>
    %133 = arith.mulf %132, %123 : vector<1x16xf32>
    %134 = math.absf %133 : vector<1x16xf32>
    %135 = arith.mulf %134, %129 : vector<1x16xf32>
    %136 = arith.addf %108, %114 : vector<1x16x16xf32>
    %137 = arith.mulf %136, %118 : vector<1x16x16xf32>
    %138 = vector.shape_cast %137 : vector<1x16x16xf32> to vector<1x1x16x16xf32>
    %cst_65 = arith.constant dense<0.000000e+00> : vector<1xf32>
    %139 = vector.multi_reduction <add>, %138, %cst_65 [1, 2, 3] : vector<1x1x16x16xf32> to vector<1xf32>
    %140 = vector.shape_cast %139 : vector<1xf32> to vector<1x1x1x1xf32>
    %141 = vector.extract %140[0, 0, 0, 0] : f32 from vector<1x1x1x1xf32>
    %142 = vector.shape_cast %135 : vector<1x16xf32> to vector<1x1x16xf32>
    %cst_66 = arith.constant dense<0.000000e+00> : vector<1xf32>
    %143 = vector.multi_reduction <add>, %142, %cst_66 [1, 2] : vector<1x1x16xf32> to vector<1xf32>
    %144 = vector.shape_cast %143 : vector<1xf32> to vector<1x1x1xf32>
    %145 = vector.extract %144[0, 0, 0] : f32 from vector<1x1x1xf32>
    %146 = arith.addf %141, %145 : f32
    %147 = vector.shape_cast %118 : vector<1x16x16xf32> to vector<1x1x16x16xf32>
    %cst_67 = arith.constant dense<0.000000e+00> : vector<1xf32>
    %148 = vector.multi_reduction <add>, %147, %cst_67 [1, 2, 3] : vector<1x1x16x16xf32> to vector<1xf32>
    %149 = vector.shape_cast %148 : vector<1xf32> to vector<1x1x1x1xf32>
    %150 = vector.extract %149[0, 0, 0, 0] : f32 from vector<1x1x1x1xf32>
    %151 = vector.extract_strided_slice %1 {offsets = [0, 15, 0], sizes = [1, 1, 16], strides = [1, 1, 1]} : vector<1x16x16xf32> to vector<1x1x16xf32>
    %152 = vector.shape_cast %151 : vector<1x1x16xf32> to vector<1x16xf32>
    %c0_68 = arith.constant 0 : index
    %c0_69 = arith.constant 0 : index
    %153 = vector.load %arg6[%c0_68, %c0_69] : memref<1x16xf32, #tpu.memory_space<vmem>>, vector<1x16xf32>
    tpu.vector_store %arg6[%c0_68, %c0_69], %152 {strides = array<i32>} : memref<1x16xf32, #tpu.memory_space<vmem>>, vector<1x16xf32>,
    %154 = vector.extract_strided_slice %3 {offsets = [0, 15, 0], sizes = [1, 1, 16], strides = [1, 1, 1]} : vector<1x16x16xf32> to vector<1x1x16xf32>
    %155 = vector.shape_cast %154 : vector<1x1x16xf32> to vector<1x16xf32>
    %c0_70 = arith.constant 0 : index
    %c0_71 = arith.constant 0 : index
    %156 = vector.load %arg7[%c0_70, %c0_71] : memref<1x16xf32, #tpu.memory_space<vmem>>, vector<1x16xf32>
    tpu.vector_store %arg7[%c0_70, %c0_71], %155 {strides = array<i32>} : memref<1x16xf32, #tpu.memory_space<vmem>>, vector<1x16xf32>,
    %157 = tpu.iota {dimensions = array<i32: 3>} : vector<1x1x8x128xi32>
    %c0_i32_72 = arith.constant 0 : i32
    %158 = vector.broadcast %c0_i32_72 : i32 to vector<1x1x8x128xi32>
    %159 = arith.cmpi eq, %157, %158 : vector<1x1x8x128xi32>
    %cst_73 = arith.constant 0.000000e+00 : f32
    %160 = vector.broadcast %146 : f32 to vector<1x1x8x128xf32>
    %161 = vector.broadcast %cst_73 : f32 to vector<1x1x8x128xf32>
    %162 = arith.select %159, %160, %161 : vector<1x1x8x128xi1>, vector<1x1x8x128xf32>
    %c1_i32_74 = arith.constant 1 : i32
    %163 = vector.broadcast %c1_i32_74 : i32 to vector<1x1x8x128xi32>
    %164 = arith.cmpi eq, %157, %163 : vector<1x1x8x128xi32>
    %cst_75 = arith.constant 0.000000e+00 : f32
    %165 = vector.broadcast %150 : f32 to vector<1x1x8x128xf32>
    %166 = vector.broadcast %cst_75 : f32 to vector<1x1x8x128xf32>
    %167 = arith.select %164, %165, %166 : vector<1x1x8x128xi1>, vector<1x1x8x128xf32>
    %168 = arith.addf %162, %167 : vector<1x1x8x128xf32>
    %c0_76 = arith.constant 0 : index
    %c0_77 = arith.constant 0 : index
    %c0_78 = arith.constant 0 : index
    %c0_79 = arith.constant 0 : index
    %169 = vector.load %arg5[%c0_76, %c0_77, %c0_78, %c0_79] : memref<1x1x8x128xf32, #tpu.memory_space<vmem>>, vector<1x1x8x128xf32>
    tpu.vector_store %arg5[%c0_76, %c0_77, %c0_78, %c0_79], %168 {strides = array<i32>} : memref<1x1x8x128xf32, #tpu.memory_space<vmem>>, vector<1x1x8x128xf32>,
    return
  }
  func.func @transform_0(%arg0: i32, %arg1: i32) -> (i32, i32, i32, i32) {
    %c0_i32 = arith.constant 0 : i32
    %c0_i32_0 = arith.constant 0 : i32
    %c0_i32_1 = arith.constant 0 : i32
    return %arg0, %c0_i32, %arg1, %c0_i32_0 : i32, i32, i32, i32
  }
  func.func @transform_1(%arg0: i32, %arg1: i32) -> (i32, i32, i32, i32, i32) {
    %c0_i32 = arith.constant 0 : i32
    %c0_i32_0 = arith.constant 0 : i32
    %c0_i32_1 = arith.constant 0 : i32
    %c0_i32_2 = arith.constant 0 : i32
    return %arg0, %c0_i32, %c0_i32_0, %arg1, %c0_i32_1 : i32, i32, i32, i32, i32
  }
  func.func @transform_2(%arg0: i32, %arg1: i32) -> (i32, i32, i32, i32, i32) {
    %c0_i32 = arith.constant 0 : i32
    %c0_i32_0 = arith.constant 0 : i32
    %c0_i32_1 = arith.constant 0 : i32
    %c0_i32_2 = arith.constant 0 : i32
    return %arg0, %c0_i32, %c0_i32_0, %arg1, %c0_i32_1 : i32, i32, i32, i32, i32
  }
  func.func @transform_3(%arg0: i32, %arg1: i32) -> (i32, i32, i32, i32) {
    %c0_i32 = arith.constant 0 : i32
    %c0_i32_0 = arith.constant 0 : i32
    %c0_i32_1 = arith.constant 0 : i32
    return %arg0, %arg1, %c0_i32, %c0_i32_0 : i32, i32, i32, i32
  }
}

</mosaic_0001>

<bundles_post_ra>
// kernel: tpu_custom_call.1
= control target key start
LH: loop header
LB: loop body
LE: loop exit
PB: predicated region body
PF: predicated region fallthrough
CT: control target
= control target key end

     0   :  { %s1573_s0 = inlined_call_operand.hbm [shape: f32[2,1,16,16], index: 0, kind: input, shape index: {}]   ;;  %s1574_s1 = inlined_call_operand.hbm [shape: f32[2,2,1,16,16], index: 1, kind: input, shape index: {}]   ;;  %s1575_s2 = inlined_call_operand.hbm [shape: bf16[2,2,3,16,16], index: 2, kind: input, shape index: {}]   ;;  %s1576_s3 = inlined_call_operand.hbm [shape: f32[2,1,8,128], index: 3, kind: output, shape index: {}]  }
   0x1   :  { %1582 = sst [smem:[#allocation16_spill]] %s1573_s0 }
   0x2   :  { %1583 = sst [smem:[#allocation17_spill]] %s1574_s1 }
   0x3   :  { %8 = vsyncpa [#allocation6], 0 }
   0x4   :  { %10 = vsyncpa [#allocation6 + $0x1], 0 }
   0x5   :  { %11 = vsyncpa [#allocation9], 0 }
   0x6   :  { %13 = vsyncpa [#allocation9 + $0x1], 0 }
   0x7   :  { %14 = vsyncpa [#allocation7], 0 }
   0x8   :  { %16 = vsyncpa [#allocation7 + $0x1], 0  ;;  %s1128_s12 = smov 0   ;;  %s1130_s13 = smov 0  }
   0x9   :  { %s1132_s14 = smov 0   ;;  %s1134_s15 = smov 0  }
   0xa   :  { %s1136_s16 = smov 0   ;;  %s1138_s17 = smov 0  }
   0xb LB: > { %s1159_s18 = sadd.s32 4294967295, %s1093_s17   ;;  %s776_s19 = sadd.s32 4294967294, %s1093_s17   ;;  %s1093_s17 = sphi %s1138_s17, %s22_s17   ;;  %s1089_s16 = sphi %s1136_s16, %s1606_s16   ;;  %s1085_s15 = sphi %s1134_s15, %s1605_s15   ;;  %s1081_s14 = sphi %s1132_s14, %s1604_s14   ;;  %s1077_s13 = sphi %s1130_s13, %s1603_s13   ;;  %s1073_s12 = sphi %s1128_s12, %s1602_s12  }
   0xc   : > { %s34_s20 = sadd.s32 1, %s1089_s16  ;;  %s43_s21 = sadd.s32 1, %s1081_s14 }
   0xd   : > { %p36_p0 = scmp.ge.s32.totalorder %s34_s20, 2  ;;  %p50_p1 = scmp.ne.s32.totalorder %s1081_s14, %s1077_s13 }
   0xe   : > { %p51_p2 = scmp.eq.s32.totalorder %s1093_s17, 0  ;;  %p56_p3 = scmp.ne.s32.totalorder %s1077_s13, %s1073_s12 }
   0xf   : > { %s1608_s20 = smov (%p36_p0, %s34_s20), 0  ;;  %p57_p5 = scmp.eq.s32.totalorder %s1159_s18, 0 }
  0x10   : > { %1584 = sst [smem:[#allocation15_spill]] %s1608_s20  ;;  %p1171_p4 = por %p51_p2, %p50_p1 }
  0x11   : > { %s38_s23 = ssub.s32 %s1089_s16, %s1608_s20  ;;  %p138_p6 = scmp.eq.s32.totalorder %s1159_s18, 1 }
  0x12   : > { %p41_p7 = scmp.eq.s32.totalorder %s38_s23, 0  ;;  %p1179_p8 = por %p57_p5, %p56_p3 }
  0x13   : > { %p1183_p9 = por %p138_p6, %p50_p1  ;;  %p144_p10 = scmp.eq.s32.totalorder %s776_s19, 1 }
  0x14   : > { %s1586_s24 = scalar_select %p1179_p8, 1, 0 }
  0x15   : > { %s1587_s25 = scalar_select %p1183_p9, 1, 0 }
  0x16   : > { %s1188_s26 = scalar_select %p41_p7, %s1081_s14, %s43_s21  }
  0x17   : > { %p1190_p11 = por %p144_p10, %p56_p3  ;;  %p848_p13 = scmp.lt.s32.totalorder %s1093_s17, 2 }
  0x18   : > { %s1197_s28 = sand.u32 1, %s1081_s14   ;;  %s187_s4 = sand.u32 1, %s1093_s17  }
  0x19   : > { %s1588_s27 = scalar_select %p1190_p11, 1, 0 }
  0x1a   : > { %s779_s29 = sshll.u32 %s1197_s28, 4  ;;  %p1202_p0 = pnand %p848_p13, %p1171_p4 }
  0x1b   : > { %s802_s5 = sshll.u32 %s1089_s16, 9  ;;  %s191_s6 = scalar_lea.vmem [#allocation8], %s779_s29 }
  0x1c   : > { %s200_s7 = sshll.u32 %s191_s6, 4  ;;  %s1590_s1 = sld [smem:[#allocation17_spill]]  ;;  %s1215_s7 = int_to_ptr.vmem [resolvable:$true] %s200_s7 }
  0x1d   : > { %s1217_s11 = scalar_lea.sflag [#allocation9], %s187_s4  ;;  %p1223_p2 = pneg %p1202_p0 }
  0x22   : > { %s1213_s10 = scalar_lea.hbm %s1590_s1, %s802_s5  ;;  %s922_s5 = scalar_lea.hbm %s1590_s1, 1024 }
  0x23   : > { %s917_s19 = scalar_lea.hbm %s1213_s10, 256  ;;  %p923_p5 = scmp.lt.u32.totalorder %s1213_s10, %s1590_s1 }
  0x24   : > { %p918_p1 = scmp.ne.s32.totalorder %s1213_s10, %s917_s19  ;;  %p924_p6 = scmp.lt.u32.totalorder %s922_s5, %s917_s19 }
  0x25   : > { %p926_p10 = scmp.lt.u32.totalorder %s917_s19, %s1213_s10 }
  0x26   : > { %p920_p3 = pnand %p1223_p2, %p918_p1  ;;  %p925_p7 = por %p924_p6, %p923_p5 }
  0x28   : > { %p921_p4 = pneg %p920_p3  ;;  %p927_p13 = por %p926_p10, %p925_p7 }
  0x2a   : > { %p928_p12 = pnand %p927_p13, %p921_p4 }
  0x2c   : > { %931 = shalt.err (!%p928_p12)
}
  0x2d   : > { %s932_s4 = scalar_lea.vmem %s1215_s7, 256  ;;  %s1095_s9 = smov [#allocation8]  }
  0x2e   : > { %p933_p1 = scmp.ne.s32.totalorder %s1215_s7, %s932_s4  ;;  %s937_s22 = sshll.u32 %s1095_s9, 4  ;;  %s938_s22 = int_to_ptr.vmem [resolvable:$false] %s937_s22 }
  0x2f   : > { %s939_s23 = scalar_lea.vmem %s938_s22, 512  ;;  %p940_p9 = scmp.lt.s32.totalorder %s1215_s7, %s938_s22 }
  0x30   : > { %p935_p3 = pnand %p933_p1, %p1223_p2  ;;  %p941_p8 = scmp.lt.s32.totalorder %s939_s23, %s932_s4 }
  0x32   : > { %p936_p11 = pneg %p935_p3  ;;  %p942_p5 = por %p941_p8, %p940_p9 }
  0x34   : > { %p943_p6 = pnand %p942_p5, %p936_p11 }
  0x36   : > { %946 = shalt.err (!%p943_p6)
}
  0x37   : > { %s1579_s19 = smov 128   ;;  %s1580_s5 = smov 8  }
  0x38   : > { %840 = dma.hbm_to_vmem [thread:$0]  (!%p1202_p0), %s1213_s10, 256, %s1215_s7, %s1217_s11, %s1579_s19, %s1579_s19, %s1580_s5  }
  0x39   : > { %p786_p8 = scmp.ge.s32.totalorder %s1093_s17, 1  ;;  %p231_p9 = scmp.lt.s32.totalorder %s1093_s17, 3 }
  0x3a   : > { %s801_s8 = sshll.u32 %s1089_s16, 8  ;;  %s1593_s0 = sld [smem:[#allocation16_spill]] }
  0x3b   : > { %p1252_p11 = pnand %p786_p8, %p231_p9  ;;  %s168_s23 = scalar_lea.vmem [#allocation5], %s779_s29 }
  0x3c   : > { %s177_s1 = sshll.u32 %s168_s23, 4  ;;  %s817_s7 = smul.u32 24, %s1197_s28  ;;  %s1264_s1 = int_to_ptr.vmem [resolvable:$true] %s177_s1 }
  0x3d   : > { %s1592_s6 = scalar_select %p1252_p11, 1, 0 }
  0x3e   : > { %s165_s10 = scalar_lea.sflag [#allocation6], %s1197_s28 }
  0x40   : > { %s1260_s22 = scalar_lea.hbm %s1593_s0, %s801_s8  ;;  %s952_s8 = scalar_lea.hbm %s1593_s0, 512 }
  0x41   : > { %s947_s19 = scalar_lea.hbm %s1260_s22, 256  ;;  %p953_p10 = scmp.lt.u32.totalorder %s1260_s22, %s1593_s0 }
  0x42   : > { %p948_p12 = scmp.ne.s32.totalorder %s1260_s22, %s947_s19  ;;  %p954_p13 = scmp.lt.u32.totalorder %s952_s8, %s947_s19 }
  0x43   : > { %p956_p3 = scmp.lt.u32.totalorder %s947_s19, %s1260_s22 }
  0x44   : > { %p950_p4 = pnand %p948_p12, %p1223_p2  ;;  %p955_p1 = por %p954_p13, %p953_p10 }
  0x46   : > { %p951_p7 = pneg %p950_p4  ;;  %p957_p5 = por %p956_p3, %p955_p1 }
  0x48   : > { %p958_p6 = pnand %p957_p5, %p951_p7 }
  0x4a   : > { %961 = shalt.err (!%p958_p6)
}
  0x4b   : > { %s962_s29 = scalar_lea.vmem %s1264_s1, 256  ;;  %s1098_s5 = smov [#allocation5]  }
  0x4c   : > { %p963_p8 = scmp.ne.s32.totalorder %s1264_s1, %s962_s29  ;;  %s967_s23 = sshll.u32 %s1098_s5, 4  ;;  %s968_s23 = int_to_ptr.vmem [resolvable:$false] %s967_s23 }
  0x4d   : > { %s969_s20 = scalar_lea.vmem %s968_s23, 512  ;;  %p970_p4 = scmp.lt.s32.totalorder %s1264_s1, %s968_s23 }
  0x4e   : > { %p965_p9 = pnand %p963_p8, %p1223_p2  ;;  %p971_p11 = scmp.lt.s32.totalorder %s969_s20, %s962_s29 }
  0x50   : > { %p966_p12 = pneg %p965_p9  ;;  %p972_p10 = por %p971_p11, %p970_p4 }
  0x52   : > { %p973_p13 = pnand %p972_p10, %p966_p12 }
  0x54   : > { %976 = shalt.err (!%p973_p13)
}
  0x55   : > { %s1594_s19 = smov 8   ;;  %s1595_s4 = smov 128  }
  0x56   : > { %837 = dma.hbm_to_vmem [thread:$0]  (!%p1202_p0), %s1260_s22, 256, %s1264_s1, %s165_s10, %s1595_s4, %s1595_s4, %s1594_s19  }
  0x57   : > { %s818_s8 = smul.u32 768, %s1089_s16  ;;  %s214_s9 = scalar_lea.vmem [#allocation10], %s817_s7 }
  0x58   : > { %s223_s29 = sshll.u32 %s214_s9, 4  ;;  %s982_s22 = scalar_lea.hbm %s1575_s2, 1536  ;;  %s1302_s29 = int_to_ptr.vmem [resolvable:$true] %s223_s29 }
  0x59   : > { %s1300_s20 = scalar_lea.hbm %s1575_s2, %s818_s8 }
  0x5a   : > { %s977_s0 = scalar_lea.hbm %s1300_s20, 384  ;;  %p983_p3 = scmp.lt.u32.totalorder %s1300_s20, %s1575_s2 }
  0x5b   : > { %p978_p11 = scmp.ne.s32.totalorder %s1300_s20, %s977_s0  ;;  %p984_p5 = scmp.lt.u32.totalorder %s982_s22, %s977_s0 }
  0x5c   : > { %p986_p8 = scmp.lt.u32.totalorder %s977_s0, %s1300_s20 }
  0x5d   : > { %p980_p7 = pnand %p978_p11, %p1223_p2  ;;  %p985_p6 = por %p984_p5, %p983_p3 }
  0x5f   : > { %p981_p1 = pneg %p980_p7  ;;  %p987_p9 = por %p986_p8, %p985_p6 }
  0x61   : > { %p988_p12 = pnand %p987_p9, %p981_p1 }
  0x63   : > { %991 = shalt.err (!%p988_p12)
}
  0x64   : > { %s992_s19 = scalar_lea.vmem %s1302_s29, 384  ;;  %s1099_s4 = smov [#allocation10]  }
  0x65   : > { %p993_p4 = scmp.ne.s32.totalorder %s1302_s29, %s992_s19  ;;  %s997_s8 = sshll.u32 %s1099_s4, 4  ;;  %s998_s8 = int_to_ptr.vmem [resolvable:$false] %s997_s8 }
  0x66   : > { %s999_s9 = scalar_lea.vmem %s998_s8, 768  ;;  %p1000_p11 = scmp.lt.s32.totalorder %s1302_s29, %s998_s8 }
  0x67   : > { %p995_p10 = pnand %p993_p4, %p1223_p2  ;;  %p1001_p7 = scmp.lt.s32.totalorder %s999_s9, %s992_s19 }
  0x69   : > { %p996_p13 = pneg %p995_p10  ;;  %p1002_p3 = por %p1001_p7, %p1000_p11 }
  0x6b   : > { %p1003_p5 = pnand %p1002_p3, %p996_p13 }
  0x6d   : > { %1006 = shalt.err (!%p1003_p5)
}
  0x6e   : > { %s1100_s0 = smov 64   ;;  %s1101_s5 = smov 4  }
  0x6f   : > { %843 = dma.hbm_to_vmem [thread:$0]  (!%p1202_p0), %s1300_s20, 384, %s1302_s29, %s1217_s11, %s1100_s0, %s1100_s0, %s1101_s5  }
  0x70   : > { %p1596_p2 = scmp.ne.s32.totalorder %s1592_s6, 0 }
  0x71   : > { %s1329_s21 = sand.u32 (!%p1596_p2), 1, %s1077_s13   ;;  %p1597_p1 = scmp.ne.s32.totalorder (!%p1596_p2), %s1586_s24, 0 }
  0x72   : > { %235 = sbr.rel (%p1596_p2) target bundleno = 1103 (0x44f), region = 32  ;;  %s787_s23 = sshll.u32 (!%p1596_p2), %s1329_s21, 4 }
  0x73   : > { %s238_s1 = scalar_lea.sflag (!%p1596_p2), [#allocation6], %s1329_s21  ;;  %s1333_s28 = scalar_lea.vmem (!%p1596_p2), [#allocation5], %s787_s23 }
  0x79   : > { %1060 = dma.done.wait (%p1597_p1), %s238_s1, 256  }
  0x7a   : > { %1062 = vsyncadd (%p1597_p1), %s238_s1, 4294967040  ;;  %s246_s30 = sand.u32 1, %s1159_s18   ;;  %s250_s6 = scalar_lea.vmem [#allocation8], %s787_s23 }
  0x7b   : > { %s247_s11 = scalar_lea.sflag [#allocation9], %s246_s30 }
  0x7c   : > { %1064 = dma.done.wait (%p1597_p1), %s247_s11, 640  }
  0x7d   : > { %1066 = vsyncadd (%p1597_p1), %s247_s11, 4294966656  ;;  %s819_s29 = smul.u32 24, %s1329_s21  ;;  %v1345_v0 = vld [vmem:[%s250_s6] sm:$0xff]  ;;  %v1347_v7 = vld [vmem:[%s250_s6 + $0x8] sm:$0xff]  ;;  %s1102_s18 = smov 16   ;;  %vm315_vm0 = vcmask 1047680  }
  0x7e   : > { %v1380_v17 = vld [vmem:[%s1333_s28] sm:$0xff]  ;;  %v1383_v18 = vld [vmem:[%s1333_s28 + $0x8] sm:$0xff]  ;;  %s1103_s24 = smov 1   ;;  %s1104_s22 = smov 127   ;;  %vm303_vm1 = vcmask 122880   ;;  %vm359_vm3 = vcmask 130055  }
  0x7f   : > { %s259_s20 = scalar_lea.vmem [#allocation10], %s819_s29  ;;  %s1106_s7 = smov 113   ;;  %vm559_vm8 = vcmp.gt.f32.partialorder %v1345_v0, 0.5  ;;  %vm560_vm9 = vcmp.gt.f32.partialorder %v1347_v7, 0.5  ;;  %vm582_vm10 = vcmask 130048  }
  0x80   : > { %v804_v1 = vld [vmem:[%s259_s20] sm:$0xff]   ;;  %v815_v2 = vld [vmem:[%s259_s20 + $0x8] sm:$0xff]   ;;  %v816_v8 = vld [vmem:[%s259_s20 + $0x10] sm:$0xff]   ;;  %s789_s10 = sshll.u32 %s1329_s21, 3  ;;  %s798_s9 = sshll.u32 %s1085_s15, 7 }
  0x81   : > { %v805_v3 = vunpack.c.l.bf16 %v804_v1  ;;  %v809_v4 = vunpack.c.l.bf16 %v815_v2  ;;  %v806_v5 = vunpack.c.h.bf16 %v804_v1  ;;  %v810_v6 = vunpack.c.h.bf16 %v815_v2  ;;  %s291_s5 = scalar_lea.vmem [#allocation11], %s789_s10  ;;  %s1524_s30 = scalar_lea.hbm %s1576_s3, %s798_s9 }
  0x82   : > { %v813_v13 = vunpack.c.l.bf16 %v816_v8  ;;  %v814_v14 = vunpack.c.h.bf16 %v816_v8  ;;  %s644_s23 = sshll.u32 %s291_s5, 4  ;;  %s630_s15 = scalar_lea.sflag [#allocation7], %s1329_s21  ;;  %s1526_s23 = int_to_ptr.vmem [resolvable:$true] %s644_s23 }
  0x83   : > { %v1350_v9 = vmul.f32 %v805_v3, %v1345_v0  ;;  %v1353_v10 = vmul.f32 %v809_v4, %v1345_v0  ;;  %v1360_v11 = vmul.f32 %v806_v5, %v1347_v7  ;;  %v1363_v12 = vmul.f32 %v810_v6, %v1347_v7  ;;  %s1007_s11 = scalar_lea.vmem %s1526_s23, 128  ;;  %p1598_p6 = scmp.ne.s32.totalorder %s1587_s25, 0 }
  0x84   : > { %v1370_v15 = vmul.f32 %v813_v13, %v1345_v0  ;;  %v1373_v16 = vmul.f32 %v814_v14, %v1347_v7  ;;  %p1008_p0 = scmp.ne.s32.totalorder %s1526_s23, %s1007_s11  ;;  %s1107_s6 = smov [#allocation11]  }
  0x85   : > { %316 = vrot.lane.b32.xlu0 %v1350_v9, %s1102_s18  ;;  %368 = vrot.lane.b32.xlu1 %v1353_v10, %s1102_s18  ;;  %s1011_s29 = sshll.u32 %s1107_s6, 4  ;;  %s1012_s29 = int_to_ptr.vmem [resolvable:$false] %s1011_s29 }
  0x86   : > { %p1009_p8 = pnand %p1008_p0, %p1598_p6  ;;  %s1013_s20 = scalar_lea.vmem %s1012_s29, 256 }
  0x87   : > { %p1014_p12 = scmp.lt.s32.totalorder %s1526_s23, %s1012_s29  ;;  %p1015_p4 = scmp.lt.s32.totalorder %s1013_s20, %s1007_s11 }
  0x88   : > { %p1010_p9 = pneg %p1009_p8 }
  0x89   : > { %319 = vrot.lane.b32.xlu0 %v1360_v11, %s1102_s18  ;;  %371 = vrot.lane.b32.xlu1 %v1363_v12, %s1102_s18  ;;  %p1016_p10 = por %p1015_p4, %p1014_p12 }
  0x8b   : > { %p1017_p13 = pnand %p1016_p10, %p1010_p9 }
  0x8d   : > { %417 = vrot.lane.b32.xlu0 %v1370_v15, %s1102_s18  ;;  %420 = vrot.lane.b32.xlu1 %v1373_v16, %s1102_s18 }
  0x91   : > { %475 = vrot.lane.b32.xlu0 %v1380_v17, %s1102_s18  ;;  %478 = vrot.lane.b32.xlu1 %v1383_v18, %s1102_s18 }
  0x95   : > { %330 = vrot.lane.b32.xlu0 %v1350_v9, %s1103_s24  ;;  %332 = vrot.lane.b32.xlu1 %v1360_v11, %s1103_s24 }
  0x99   : > { %382 = vrot.lane.b32.xlu0 %v1353_v10, %s1103_s24  ;;  %384 = vrot.lane.b32.xlu1 %v1363_v12, %s1103_s24 }
  0xf7   : > { %v317_v19 = vpop.permute.xlu0 %316  ;;  %v369_v20 = vpop.permute.xlu1 %368 }
  0xf8   : > { %v318_v21 = vsel %vm315_vm0, %v317_v19, %v1350_v9  ;;  %v370_v22 = vsel %vm315_vm0, %v369_v20, %v1353_v10 }
  0xf9   : > { %322 = vrot.lane.b32.xlu0 %v318_v21, %s1102_s18 }
  0xfb   : > { %v320_v23 = vpop.permute.xlu0 %319  ;;  %v372_v24 = vpop.permute.xlu1 %371 }
  0xfc   : > { %v321_v25 = vsel %vm315_vm0, %v320_v23, %v1360_v11  ;;  %v373_v26 = vsel %vm315_vm0, %v372_v24, %v1363_v12 }
  0xfd   : > { %324 = vrot.lane.b32.xlu1 %v321_v25, %s1102_s18  ;;  %374 = vrot.lane.b32.xlu0 %v370_v22, %s1102_s18 }
  0xff   : > { %v418_v27 = vpop.permute.xlu0 %417  ;;  %v421_v28 = vpop.permute.xlu1 %420 }
 0x100   : > { %v419_v29 = vsel %vm315_vm0, %v418_v27, %v1370_v15  ;;  %v422_v30 = vsel %vm315_vm0, %v421_v28, %v1373_v16 }
 0x101   : > { %376 = vrot.lane.b32.xlu1 %v373_v26, %s1102_s18  ;;  %423 = vrot.lane.b32.xlu0 %v419_v29, %s1102_s18 }
 0x103   : > { %v476_v31 = vpop.permute.xlu0 %475  ;;  %v479_v33 = vpop.permute.xlu1 %478 }
 0x104   : > { %v477_v32 = vsel %vm315_vm0, %v476_v31, %v1380_v17  ;;  %v480_v34 = vsel %vm315_vm0, %v479_v33, %v1383_v18 }
 0x105   : > { %425 = vrot.lane.b32.xlu1 %v422_v30, %s1102_s18  ;;  %431 = vrot.lane.b32.xlu0 %v1370_v15, %s1103_s24 }
 0x107   : > { %v331_v35 = vpop.permute.xlu0 %330  ;;  %v333_v36 = vpop.permute.xlu1 %332 }
 0x109   : > { %433 = vrot.lane.b32.xlu1 %v1373_v16, %s1103_s24  ;;  %481 = vrot.lane.b32.xlu0 %v477_v32, %s1102_s18 }
 0x10b   : > { %v383_v37 = vpop.permute.xlu0 %382  ;;  %v385_v38 = vpop.permute.xlu1 %384 }
 0x10d   : > { %483 = vrot.lane.b32.xlu1 %v480_v34, %s1102_s18  ;;  %489 = vrot.lane.b32.xlu0 %v1380_v17, %s1103_s24 }
 0x111   : > { %491 = vrot.lane.b32.xlu1 %v1383_v18, %s1103_s24 }
 0x16b   : > { %v323_v39 = vpop.permute.xlu0 %322 }
 0x16c   : > { %v326_v43 = vsel %vm315_vm0, %v323_v39, %v1350_v9 }
 0x16d   : > { %v336_v47 = vsub.f32 %v326_v43, %v331_v35 }
 0x16f   : > { %v325_v40 = vpop.permute.xlu1 %324  ;;  %v375_v41 = vpop.permute.xlu0 %374  ;;  %v338_v55 = vand.u32 2147483647, %v336_v47 }
 0x170   : > { %v378_v42 = vsel %vm315_vm0, %v375_v41, %v1353_v10  ;;  %v327_v49 = vsel %vm315_vm0, %v325_v40, %v1360_v11  ;;  %v1105_v41 = vmov 0.0  }
 0x171   : > { %v388_v44 = vsub.f32 %v378_v42, %v383_v37  ;;  %v337_v56 = vsub.f32 %v327_v49, %v333_v36  ;;  %304 = vst.msk [vmem:[#allocation2] sm:$0x1] %vm303_vm1, %v1105_v41  ;;  %305 = vst.msk [vmem:[#allocation3] sm:$0x1] %vm303_vm1, %v1105_v41 }
 0x172   : > { %306 = vst.msk [vmem:[#allocation4] sm:$0x1] %vm303_vm1, %v1105_v41  ;;  %307 = vst.msk [vmem:[#allocation4 + $0x1] sm:$0x1] %vm303_vm1, %v1105_v41 }
 0x173   : > { %v377_v45 = vpop.permute.xlu1 %376  ;;  %v424_v46 = vpop.permute.xlu0 %423  ;;  %v390_v51 = vand.u32 2147483647, %v388_v44  ;;  %v339_v63 = vand.u32 2147483647, %v337_v56  ;;  %308 = vst.msk [vmem:[#allocation4 + $0x2] sm:$0x1] %vm303_vm1, %v1105_v41 }
 0x174   : > { %v379_v48 = vsel %vm315_vm0, %v377_v45, %v1363_v12  ;;  %v427_v50 = vsel %vm315_vm0, %v424_v46, %v1370_v15 }
 0x175   : > { %v389_v52 = vsub.f32 %v379_v48, %v385_v38  ;;  %v392_v59 = vadd.f32 %v390_v51, %v338_v55 }
 0x177   : > { %v426_v53 = vpop.permute.xlu1 %425  ;;  %v432_v54 = vpop.permute.xlu0 %431  ;;  %v391_v58 = vand.u32 2147483647, %v389_v52 }
 0x178   : > { %v437_v57 = vsub.f32 %v427_v50, %v432_v54  ;;  %v428_v61 = vsel %vm315_vm0, %v426_v53, %v1373_v16  ;;  %v569_v56 = vld [vmem:[#allocation2] sm:$0x1] }
 0x179   : > { %v393_v4 = vadd.f32 %v391_v58, %v339_v63  ;;  %v355_v42 = vld [vmem:[#allocation4] sm:$0x1]  ;;  %v405_v43 = vld [vmem:[#allocation4 + $0x1] sm:$0x1]  ;;  %619 = vst.msk [vmem:[#allocation2 - $0x7] sm:$0x80] %vm359_vm3, %v1383_v18 }
 0x17a   : > { %v439_v60 = vand.u32 2147483647, %v437_v57  ;;  %v356_v44 = vsub.f32 %v1350_v9, %v355_v42  ;;  %v406_v45 = vsub.f32 %v1353_v10, %v405_v43  ;;  %v454_v46 = vld [vmem:[#allocation4 + $0x2] sm:$0x1]  ;;  %v574_v57 = vsub.f32 %v1380_v17, %v569_v56  ;;  %360 = vst.msk [vmem:[#allocation4 - $0x7] sm:$0x80] %vm359_vm3, %v1360_v11 }
 0x17b   : > { %v434_v62 = vpop.permute.xlu1 %433  ;;  %v482_v19 = vpop.permute.xlu0 %481  ;;  %v455_v49 = vsub.f32 %v1370_v15, %v454_v46  ;;  %409 = vst.msk [vmem:[#allocation4 - $0x6] sm:$0x80] %vm359_vm3, %v1363_v12  ;;  %458 = vst.msk [vmem:[#allocation4 - $0x5] sm:$0x80] %vm359_vm3, %v1373_v16 }
 0x17c   : > { %v441_v1 = vadd.f32 %v439_v60, %v392_v59  ;;  %v438_v2 = vsub.f32 %v428_v61, %v434_v62  ;;  %v485_v23 = vsel %vm315_vm0, %v482_v19, %v1380_v17  ;;  %v357_v47 = vand.u32 2147483647, %v356_v44  ;;  %v570_v59 = vld [vmem:[#allocation3] sm:$0x1] }
 0x17d   : > { %v407_v48 = vand.u32 2147483647, %v406_v45  ;;  %v456_v51 = vand.u32 2147483647, %v455_v49  ;;  %vm571_vm2 = vcmp.gt.f32.partialorder %v570_v59, 0.5  ;;  %v394_v19 = vrot.slane %v1353_v10, 1 }
 0x17e   : > { %v459_v3 = vsub.f32 0.0, %v441_v1  ;;  %v440_v5 = vand.u32 2147483647, %v438_v2  ;;  %v796_v61 = vsel %vm571_vm2, 1.0, %v1105_v41  ;;  %620 = vst.msk [vmem:[#allocation3 - $0x7] sm:$0x80] %vm359_vm3, %v1347_v7 }
 0x17f   : > { %v484_v22 = vpop.permute.xlu1 %483  ;;  %v490_v24 = vpop.permute.xlu0 %489  ;;  %v408_v50 = vadd.f32 %v407_v48, %v357_v47 }
 0x180   : > { %v461_v6 = vmul.f32 0.33333334, %v459_v3  ;;  %v442_v8 = vadd.f32 %v440_v5, %v393_v4  ;;  %v495_v25 = vsub.f32 %v485_v23, %v490_v24  ;;  %v486_v27 = vsel %vm315_vm0, %v484_v22, %v1383_v18 }
 0x181   : > { %v457_v52 = vadd.f32 %v456_v51, %v408_v50  ;;  %v443_v23 = vrot.slane %v1370_v15, 1  ;;  %v444_v24 = vrot.slane %v1373_v16, 1  ;;  %v501_v50 = vrot.slane %v1380_v17, 1 }
 0x182   : > { %v463_v13 = vmul.f32 1.442695, %v461_v6  ;;  %v460_v14 = vsub.f32 0.0, %v442_v8  ;;  %v344_v6 = vlaneseq }
 0x183   : > { %v492_v28 = vpop.permute.xlu1 %491  ;;  %v565_v53 = vsub.f32 0.0, %v457_v52 }
 0x184   : > { %907 = vpow2.f32 %v463_v13  ;;  %v462_v20 = vmul.f32 0.33333334, %v460_v14  ;;  %v496_v31 = vsub.f32 %v486_v27, %v492_v28  ;;  %v345_v8 = vshrl.u32 %v344_v6, 7 }
 0x185   : > { %v566_v54 = vmul.f32 0.33333334, %v565_v53  ;;  %v342_v13 = vrot.slane %v1350_v9, 1  ;;  %v343_v14 = vrot.slane %v1360_v11, 1 }
 0x186   : > { %v465_v21 = vmul.f32 1.442695, %v462_v20  ;;  %v395_v20 = vrot.slane %v1363_v12, 1  ;;  %vm346_vm4 = vcmp.lt.s32.totalorder %v345_v8, 7  ;;  %vm551_vm5 = vcmp.lt.s32.totalorder %v345_v8, 1 }
 0x187   : > { %v567_v55 = vmul.f32 1.442695, %v566_v54 }
 0x188   : > { %909 = vpow2.f32 %v465_v21  ;;  %v347_v21 = vsel %vm346_vm4, %v342_v13, %v343_v14  ;;  %v396_v22 = vsel %vm346_vm4, %v394_v19, %v395_v20 }
 0x189   : > { %911 = vpow2.f32 %v567_v55  ;;  %v349_v27 = vsub.f32 %v347_v21, %v1350_v9  ;;  %v398_v28 = vsub.f32 %v396_v22, %v1353_v10 }
 0x18e   : > { %v908_v26 = vpop.eup %907 }
 0x18f   : > { %v497_v29 = vmul.f32 %v908_v26, %v495_v25  ;;  %v348_v25 = vsel %vm346_vm4, %v343_v14, %v342_v13  ;;  %v397_v26 = vsel %vm346_vm4, %v395_v20, %v394_v19 }
 0x191   : > { %v499_v30 = vand.u32 2147483647, %v497_v29  ;;  %v445_v29 = vsel %vm346_vm4, %v443_v23, %v444_v24 }
 0x192   : > { %v910_v32 = vpop.eup %909 }
 0x193   : > { %v498_v33 = vmul.f32 %v910_v32, %v496_v31  ;;  %519 = vrot.lane.b32.xlu0 %v499_v30, %s1104_s22  ;;  %v912_v58 = vpop.eup %911  ;;  %v350_v30 = vsub.f32 %v348_v25, %v1360_v11  ;;  %v399_v31 = vsub.f32 %v397_v26, %v1363_v12  ;;  %v446_v32 = vsel %vm346_vm4, %v444_v24, %v443_v23 }
 0x194   : > { %v575_v60 = vmul.f32 %v912_v58, %v574_v57 }
 0x195   : > { %v500_v34 = vand.u32 2147483647, %v498_v33  ;;  %v351_v33 = vand.u32 2147483647, %v349_v27 }
 0x196   : > { %v576_v62 = vand.u32 2147483647, %v575_v60  ;;  %v1508_v60 = vand.u32 127, %v344_v6 }
 0x197   : > { %521 = vrot.lane.b32.xlu1 %v500_v34, %s1104_s22  ;;  %v400_v34 = vand.u32 2147483647, %v398_v28 }
 0x198   : > { %v577_v63 = vmul.f32 %v796_v61, %v576_v62  ;;  %v513_v62 = vadd.s32 8, %v345_v8  ;;  %vm516_vm6 = vcmp.eq.s32.totalorder %v1508_v60, 15  ;;  %v795_v8 = vsel %vm560_vm9, 1.0, %v1105_v41 }
 0x199   : > { %v402_v42 = vadd.f32 %v400_v34, %v351_v33  ;;  %v608_v22 = vsel %vm582_vm10, %v795_v8, 0.0  ;;  %vm621_vm11 = vcmp.eq.s32.totalorder %v1508_v60, 0  ;;  %vm624_vm12 = vcmp.eq.s32.totalorder %v1508_v60, 1 }
 0x19a   : > { %v596_v1 = vsel %vm303_vm1, %v577_v63, 0.0  ;;  %vm548_vm7 = vcmp.eq.s32.totalorder %v513_v62, 15 }
 0x205   : > { %v1445_v35 = vpop.permute.xlu0 %519 }
 0x206   : > { %525 = vrot.lane.b32.xlu0 %v1445_v35, %s1102_s18 }
 0x209   : > { %v1449_v36 = vpop.permute.xlu1 %521 }
 0x20a   : > { %528 = vrot.lane.b32.xlu1 %v1449_v36, %s1102_s18 }
 0x278   : > { %v526_v37 = vpop.permute.xlu0 %525 }
 0x279   : > { %v527_v38 = vsel %vm315_vm0, %v526_v37, %v1445_v35  ;;  %v447_v37 = vsub.f32 %v445_v29, %v1370_v15  ;;  %v502_v15 = vrot.slane %v1383_v18, 1 }
 0x27a   : > { %531 = vrot.lane.b32.xlu0 %v527_v38, %s1102_s18  ;;  %v352_v38 = vand.u32 2147483647, %v350_v30 }
 0x27b   : > { %v449_v9 = vand.u32 2147483647, %v447_v37  ;;  %v504_v51 = vsel %vm346_vm4, %v502_v15, %v501_v50 }
 0x27c   : > { %v529_v39 = vpop.permute.xlu1 %528  ;;  %v506_v54 = vsub.f32 %v504_v51, %v1383_v18 }
 0x27d   : > { %v530_v40 = vsel %vm315_vm0, %v529_v39, %v1449_v36  ;;  %v401_v39 = vand.u32 2147483647, %v399_v31  ;;  %v451_v44 = vadd.f32 %v449_v9, %v402_v42 }
 0x27e   : > { %533 = vrot.lane.b32.xlu1 %v530_v40, %s1102_s18  ;;  %v448_v40 = vsub.f32 %v446_v32, %v1373_v16  ;;  %v503_v16 = vsel %vm346_vm4, %v501_v50, %v502_v15 }
 0x27f   : > { %v403_v43 = vadd.f32 %v401_v39, %v352_v38  ;;  %v467_v46 = vsub.f32 0.0, %v451_v44  ;;  %v505_v53 = vsub.f32 %v503_v16, %v1380_v17 }
 0x280   : > { %v450_v10 = vand.u32 2147483647, %v448_v40 }
 0x281   : > { %v469_v47 = vmul.f32 0.33333334, %v467_v46 }
 0x282   : > { %v452_v45 = vadd.f32 %v450_v10, %v403_v43 }
 0x283   : > { %v471_v48 = vmul.f32 1.442695, %v469_v47 }
 0x284   : > { %v468_v11 = vsub.f32 0.0, %v452_v45 }
 0x285   : > { %913 = vpow2.f32 %v471_v48 }
 0x286   : > { %v470_v12 = vmul.f32 0.33333334, %v468_v11 }
 0x288   : > { %v473_v49 = vmul.f32 1.442695, %v470_v12 }
 0x28a   : > { %915 = vpow2.f32 %v473_v49 }
 0x28f   : > { %v914_v52 = vpop.eup %913 }
 0x290   : > { %v507_v56 = vmul.f32 %v914_v52, %v505_v53 }
 0x292   : > { %v509_v58 = vand.u32 2147483647, %v507_v56 }
 0x294   : > { %v916_v55 = vpop.eup %915  ;;  %v549_v61 = vrot.slane %v509_v58, 7 }
 0x295   : > { %v508_v57 = vmul.f32 %v916_v55, %v506_v54 }
 0x297   : > { %v510_v59 = vand.u32 2147483647, %v508_v57 }
 0x299   : > { %v550_v63 = vrot.slane %v510_v59, 7 }
 0x2ec   : > { %v532_v2 = vpop.permute.xlu0 %531 }
 0x2ed   : > { %v535_v3 = vsel %vm315_vm0, %v532_v2, %v1445_v35  ;;  %v552_v2 = vsel %vm551_vm5, %v549_v61, %v550_v63 }
 0x2ee   : > { %539 = vrot.lane.b32.xlu0 %v535_v3, %s1106_s7  ;;  %v558_v3 = vsel %vm548_vm7, %v552_v2, %v510_v59 }
 0x2f0   : > { %v534_v4 = vpop.permute.xlu1 %533 }
 0x2f1   : > { %v536_v5 = vsel %vm315_vm0, %v534_v4, %v1449_v36  ;;  %v794_v4 = vsel %vm559_vm8, 1.0, %v1105_v41 }
 0x2f2   : > { %541 = vrot.lane.b32.xlu1 %v536_v5, %s1106_s7  ;;  %v607_v0 = vsel %vm582_vm10, %v794_v4, 0.0 }
 0x2f3   : > { %v609_v23 = vadd.f32 %v608_v22, %v607_v0 }
 0x316   : > { %597 = vadd.xlane.f32.xlu1 %v596_v1 }
 0x360   : > { %v540_v1 = vpop.permute.xlu0 %539 }
 0x361   : > { %v545_v17 = vsel %vm516_vm6, %v540_v1, %v1445_v35 }
 0x362   : > { %v578_v18 = vadd.f32 %v545_v17, %v509_v58 }
 0x364   : > { %v542_v5 = vpop.permute.xlu1 %541  ;;  %v580_v14 = vmul.f32 %v794_v4, %v578_v18 }
 0x365   : > { %v546_v6 = vsel %vm516_vm6, %v542_v5, %v1449_v36 }
 0x366   : > { %v579_v13 = vadd.f32 %v558_v3, %v546_v6  ;;  %v583_v20 = vsel %vm582_vm10, %v580_v14, 0.0 }
 0x368   : > { %v581_v19 = vmul.f32 %v795_v8, %v579_v13 }
 0x36a   : > { %v584_v21 = vsel %vm582_vm10, %v581_v19, 0.0 }
 0x36b   : > { %v585_v35 = vadd.f32 %v584_v21, %v583_v20 }
 0x36d   : > { %586 = vadd.xlane.f32.xlu0 %v585_v35 }
 0x371   : > { %610 = vadd.xlane.f32.xlu0 %v609_v23 }
 0x3a3   : > { %v598_v7 = vpop.xlane.xlu1 %597 }
 0x3a4   : > { %v599_v24 = vrot.slane %v598_v7, 4 }
 0x3a6   : > { %v600_v25 = vadd.f32 %v599_v24, %v598_v7 }
 0x3a8   : > { %v601_v26 = vrot.slane %v600_v25, 2 }
 0x3aa   : > { %v602_v41 = vadd.f32 %v601_v26, %v600_v25 }
 0x3ac   : > { %v603_v34 = vrot.slane %v602_v41, 1 }
 0x3ae   : > { %v604_v42 = vadd.f32 %v603_v34, %v602_v41 }
 0x3fa   : > { %v587_v27 = vpop.xlane.xlu0 %586 }
 0x3fb   : > { %v588_v36 = vrot.slane %v587_v27, 4 }
 0x3fd   : > { %v589_v28 = vadd.f32 %v588_v36, %v587_v27 }
 0x3fe   : > { %v611_v29 = vpop.xlane.xlu0 %610 }
 0x3ff   : > { %v590_v30 = vrot.slane %v589_v28, 2  ;;  %v612_v31 = vrot.slane %v611_v29, 4 }
 0x401   : > { %v613_v32 = vadd.f32 %v612_v31, %v611_v29  ;;  %v591_v33 = vadd.f32 %v590_v30, %v589_v28 }
 0x403   : > { %v614_v37 = vrot.slane %v613_v32, 2  ;;  %v592_v38 = vrot.slane %v591_v33, 1 }
 0x405   : > { %v615_v39 = vadd.f32 %v614_v37, %v613_v32  ;;  %v593_v40 = vadd.f32 %v592_v38, %v591_v33 }
 0x407   : > { %820 = vpush %v593_v40  ;;  %v616_v9 = vrot.slane %v615_v39, 1 }
 0x408   : > { %822 = vpush %v604_v42 }
 0x409   : > { %v617_v43 = vadd.f32 %v616_v9, %v615_v39 }
 0x40b   : > { %824 = vpush %v617_v43 }
 0x438   : > { %s821_s19 = spop %820 }
 0x439   : > { %s823_s4 = spop %822 }
 0x43a   : > { %s606_s8 = sadd.f32 %s823_s4, %s821_s19 }
 0x43c   : > { %v622_v10 = vstv %s606_s8  ;;  %s825_s0 = spop %824 }
 0x43d   : > { %v625_v44 = vstv %s825_s0  ;;  %v623_v45 = vsel %vm621_vm11, %v622_v10, 0.0 }
 0x43e   : > { %v626_v46 = vsel %vm624_vm12, %v625_v44, 0.0 }
 0x43f   : > { %v627_v11 = vadd.f32 %v626_v46, %v623_v45 }
 0x441   : > { %628 = vst [vmem:[%s291_s5] sm:$0xff] %v627_v11 }
 0x442   : > { %1020 = shalt.err (!%p1017_p13)
}
 0x443   : > { %s1021_s21 = scalar_lea.hbm %s1524_s30, 128  ;;  %s1025_s22 = scalar_lea.hbm %s1576_s3, 256 }
 0x444   : > { %p1022_p11 = scmp.ne.s32.totalorder %s1524_s30, %s1021_s21  ;;  %p1026_p5 = scmp.lt.u32.totalorder %s1524_s30, %s1576_s3 }
 0x445   : > { %p1027_p2 = scmp.lt.u32.totalorder %s1025_s22, %s1021_s21  ;;  %p1029_p0 = scmp.lt.u32.totalorder %s1021_s21, %s1524_s30 }
 0x446   : > { %p1023_p7 = pnand %p1022_p11, %p1598_p6 }
 0x447   : > { %p1028_p1 = por %p1027_p2, %p1026_p5 }
 0x448   : > { %p1024_p3 = pneg %p1023_p7 }
 0x449   : > { %p1030_p8 = por %p1029_p0, %p1028_p1 }
 0x44b   : > { %p1031_p9 = pnand %p1030_p8, %p1024_p3 }
 0x44d   : > { %1034 = shalt.err (!%p1031_p9)
}
 0x44e   : > { %832 = dma.vmem_to_hbm [thread:$0]  (%p1598_p6), %s1526_s23, 128, %s1524_s30, %s630_s15  }
 0x44f PF: > { %s656_s19 = sand.u32 1, %s1073_s12   ;;  %p1599_p12 = scmp.ne.s32.totalorder %s1588_s27, 0 }
 0x450   : > { %p1600_p4 = scmp.ge.s32.totalorder %s1093_s17, 2  ;;  %s657_s4 = scalar_lea.sflag [#allocation7], %s656_s19 }
 0x452   : > { %p845_p10 = pnand %p1600_p4, %p1599_p12 }
 0x454   : > { %1068 = dma.done.wait (!%p845_p10), %s657_s4, 128  }
 0x455   : > { %1070 = vsyncadd (!%p845_p10), %s657_s4, 4294967168  ;;  %s22_s17 = sadd.s32 1, %s1093_s17   ;;  %s1601_s25 = sld [smem:[#allocation15_spill]] }
 0x456   : > { %p19_p13 = scmp.ge.s32.totalorder %s22_s17, 4   ;;  %s1602_s12 = smov %s1077_s13 }
 0x457   : > { %s1603_s13 = smov %s1081_s14  ;;  %s1604_s14 = smov %s1188_s26 }
 0x458   : > { %s1605_s15 = smov %s1089_s16  ;;  %21 = sbr.rel (!%p19_p13) target bundleno = 11 (0xb), region = 109 }
 0x45b   : > { %s1606_s16 = smov %s1601_s25 }
 0x45f   :  { %662 = vsyncpa [#allocation6], 1 }
 0x460   :  { %664 = vsyncpa [#allocation6 + $0x1], 1 }
 0x461   :  { %665 = vsyncpa [#allocation9], 1 }
 0x462   :  { %667 = vsyncpa [#allocation9 + $0x1], 1 }
 0x463   :  { %668 = vsyncpa [#allocation7], 1 }
 0x464   :  { %670 = vsyncpa [#allocation7 + $0x1], 1 }

</bundles_post_ra>
